<compile_context>
chip_gen: v5e
topology: v5e:2x2
jax: 0.10.0
libtpu: 0.0.40
codegen_flags: <defaults>
</compile_context>

<pallas_src>
import functools

import jax
import jax.numpy as jnp
from jax.experimental import pallas as pl
from jax.experimental.pallas import tpu as pltpu


def _round_up(x, m):
    return (x + m - 1) // m * m


def graph_clf_kernel(n_valid, batch_ref, x_ref, invc_ref, w_ref, b_ref,
                     out_ref, acc_ref):
    """One grid step processes one tile of nodes.

    n_valid:   int (static)       -- number of real (unpadded) nodes
    batch_ref: [1, tile_n] int32  -- graph id per node
    x_ref:     [tile_n, D]        -- node-representation tile (original dtype)
    invc_ref:  [B, 1] f32         -- precomputed 1 / max(node_count, 1)
    w_ref:     [D, T_pad] bf16    -- linear weight
    b_ref:     [1, T_pad] f32     -- linear bias
    out_ref:   [B, T_pad] f32     -- logits (written on last step only)
    acc_ref:   [B, D] f32 scratch -- running per-graph feature sum
    """
    step = pl.program_id(0)

    @pl.when(step == 0)
    def _init():
        acc_ref[...] = jnp.zeros_like(acc_ref)

    B = acc_ref.shape[0]
    tile_n = x_ref.shape[0]

    # Zero stale rows of a ragged last tile (out-of-bounds VMEM content is
    # undefined and could contain NaN/Inf that would poison the accumulator).
    row = jax.lax.broadcasted_iota(jnp.int32, (tile_n, 1), 0) + step * tile_n
    x_tile = jnp.where(row < n_valid, x_ref[...], 0.0)

    # One-hot membership for this node tile.  Compare stays in int32; only the
    # MXU operands are cast to bf16 (no bf16 VPU on v5e).
    graph_ids = jax.lax.broadcasted_iota(jnp.int32, (B, tile_n), 0)
    onehot = (batch_ref[...] == graph_ids).astype(jnp.bfloat16)     # [B, tile_n]

    acc_ref[...] += jnp.dot(onehot, x_tile.astype(jnp.bfloat16),
                            preferred_element_type=jnp.float32)     # [B, D]

    @pl.when(step == pl.num_programs(0) - 1)
    def _finalize():
        pooled = acc_ref[...] * invc_ref[...]                        # [B, D] f32
        logits = jnp.dot(pooled.astype(jnp.bfloat16), w_ref[...],
                         preferred_element_type=jnp.float32) + b_ref[...]
        out_ref[...] = logits.astype(out_ref.dtype)


def graph_clf_forward(node_representation, batch, num_graphs, weight, bias,
                      *, tile_n=1024):
    """GraphClf.forward (trans_pooling='none'): global_mean_pool + Linear."""
    x = node_representation
    N, D = x.shape
    T = weight.shape[1]

    B_pad = _round_up(num_graphs, 8)       # sublane pad for the accumulator/out
    T_pad = _round_up(T, 128)              # lane-dense output stores

    # tile_n: multiple of 128 (lane dim of the [1, tile_n] batch block, sublane
    # dim of the [tile_n, D] x block).  Clamp so no block exceeds the node
    # extent; the last tile may be ragged (masked in-kernel).
    tile_n = max(128, _round_up(int(tile_n), 128))
    if N >= 128:
        tile_n = min(tile_n, (N // 128) * 128)
        batch2d = jnp.reshape(batch.astype(jnp.int32), (1, N))
    else:
        # Tiny inputs: pad the node axis up to one full 128-row tile (trivial).
        tile_n = 128
        x = jnp.zeros((128, D), x.dtype).at[:N].set(x)
        batch2d = jnp.full((1, 128), -1, jnp.int32).at[0, :N].set(
            batch.astype(jnp.int32))
    num_tiles = pl.cdiv(x.shape[0], tile_n)

    # Per-graph node counts -> inverse, precomputed once (tiny N-int reduce).
    counts = jax.ops.segment_sum(jnp.ones((N,), jnp.float32),
                                 batch.astype(jnp.int32),
                                 num_segments=B_pad)
    inv_counts = (1.0 / jnp.maximum(counts, 1.0)).reshape(B_pad, 1)

    # Small resident operands (pad/cast cost is negligible).
    w = jnp.zeros((D, T_pad), jnp.bfloat16).at[:, :T].set(
        weight.astype(jnp.bfloat16))
    b = jnp.zeros((1, T_pad), jnp.float32).at[0, :T].set(
        bias.astype(jnp.float32))

    kernel = functools.partial(graph_clf_kernel, N)

    out = pl.pallas_call(
        kernel,
        out_shape=jax.ShapeDtypeStruct((B_pad, T_pad), jnp.float32),
        grid_spec=pltpu.PrefetchScalarGridSpec(
            num_scalar_prefetch=0,
            grid=(num_tiles,),
            in_specs=[
                pl.BlockSpec((1, tile_n), lambda n: (0, n)),   # batch ids
                pl.BlockSpec((tile_n, D), lambda n: (n, 0)),   # node features (D unpadded)
                pl.BlockSpec((B_pad, 1), lambda n: (0, 0)),    # inverse counts
                pl.BlockSpec((D, T_pad), lambda n: (0, 0)),    # linear weight
                pl.BlockSpec((1, T_pad), lambda n: (0, 0)),    # linear bias
            ],
            out_specs=pl.BlockSpec((B_pad, T_pad), lambda n: (0, 0)),
            scratch_shapes=[
                pltpu.VMEM((B_pad, D), jnp.float32),           # per-graph sum acc
            ],
        ),
        compiler_params=pltpu.CompilerParams(
            dimension_semantics=("arbitrary",),                # N is a reduction axis
            vmem_limit_bytes=32 * 1024 * 1024,
        ),
    )(batch2d, x, inv_counts, w, b)

    # Padded graph rows / task lanes carry only the bias; keep this slice.
    return out[:num_graphs, :T]


def reference_forward_f32(x, batch, num_graphs, w, b):
    """Pure-f32 JAX reference: global_mean_pool + linear."""
    onehot = (batch[None, :] == jnp.arange(num_graphs)[:, None]).astype(jnp.float32)
    counts = jnp.maximum(onehot.sum(axis=1, keepdims=True), 1.0)
    pooled = (onehot @ x) / counts
    return pooled @ w + b[None, :]


def reference_forward_bf16(x, batch, num_graphs, w, b):
    """Reference emulating the kernel's bf16-MXU / f32-accumulation path."""
    onehot = (batch[None, :] == jnp.arange(num_graphs)[:, None])
    counts = jnp.maximum(onehot.sum(axis=1).astype(jnp.float32), 1.0)
    summed = jnp.dot(onehot.astype(jnp.bfloat16), x.astype(jnp.bfloat16),
                     preferred_element_type=jnp.float32)
    pooled = summed * (1.0 / counts)[:, None]
    return jnp.dot(pooled.astype(jnp.bfloat16), w.astype(jnp.bfloat16),
                   preferred_element_type=jnp.float32) + b[None, :].astype(jnp.float32)


if __name__ == "__main__":
    key = jax.random.PRNGKey(0)
    k1, k2, k3, k4 = jax.random.split(key, 4)

    # Small, module-consistent shapes (multiple graphs, uneven sizes).
    num_graphs = 4
    graph_sizes = (70, 90, 60, 80)          # 300 nodes total
    num_nodes = sum(graph_sizes)
    feat_in = 16                            # raw node-feature dim into stand-in gnn
    emb_dim = 32                            # GNN embedding dim (emb_dim in GraphClf)
    num_tasks = 8                           # classification heads

    # --- stand-in GNN (deterministic, plain JAX): linear + ReLU ---
    x_raw = jax.random.normal(k1, (num_nodes, feat_in), dtype=jnp.float32)
    w_gnn = jax.random.normal(k2, (feat_in, emb_dim), dtype=jnp.float32) * 0.1
    node_representation = jnp.maximum(x_raw @ w_gnn, 0.0)              # [N, emb_dim]

    # data.batch: graph id per node (sorted, uneven per-graph sizes)
    batch = jnp.concatenate(
        [jnp.full((n,), g, dtype=jnp.int32) for g, n in enumerate(graph_sizes)])

    # GraphClf's Linear(emb_dim, num_tasks) parameters (deterministic init)
    weight = jax.random.normal(k3, (emb_dim, num_tasks), dtype=jnp.float32) * 0.05
    bias = jax.random.normal(k4, (num_tasks,), dtype=jnp.float32) * 0.01

    ref_bf16 = reference_forward_bf16(node_representation, batch, num_graphs,
                                      weight, bias)
    ref_f32 = reference_forward_f32(node_representation, batch, num_graphs,
                                    weight, bias)

    # Path 1: small tile -> multi-step accumulation with a ragged last tile.
    out_small = graph_clf_forward(node_representation, batch, num_graphs,
                                  weight, bias, tile_n=128)
    out_small = jax.block_until_ready(out_small)
    assert out_small.shape == (num_graphs, num_tasks)
    assert jnp.allclose(out_small, ref_bf16, atol=5e-3, rtol=5e-3)
    assert jnp.allclose(out_small, ref_f32, atol=5e-2, rtol=5e-2)

    # Path 2: default (large) tile -> clamped tile_n, ragged last tile, 2 steps.
    out_big = graph_clf_forward(node_representation, batch, num_graphs,
                                weight, bias)
    out_big = jax.block_until_ready(out_big)
    assert out_big.shape == (num_graphs, num_tasks)
    assert jnp.allclose(out_big, ref_bf16, atol=5e-3, rtol=5e-3)
    assert jnp.allclose(out_big, ref_f32, atol=5e-2, rtol=5e-2)

    print("KERNEL_OK")
</pallas_src>

<mosaic_0001>
module attributes {stable_mosaic.version = 11 : i64} {
  func.func @graph_clf_kernel(%arg0: i32, %arg1: memref<1x128xi32, #tpu.memory_space<vmem>>, %arg2: memref<128x32xf32, #tpu.memory_space<vmem>>, %arg3: memref<8x1xf32, #tpu.memory_space<vmem>>, %arg4: memref<32x128xbf16, #tpu.memory_space<vmem>>, %arg5: memref<1x128xf32, #tpu.memory_space<vmem>>, %arg6: memref<8x128xf32, #tpu.memory_space<vmem>>, %arg7: memref<8x32xf32, #tpu.memory_space<vmem>>) attributes {dimension_semantics = [#tpu.dimension_semantics<arbitrary>], iteration_bounds = array<i64: 3>, scalar_prefetch = 0 : i64, scratch_operands = 1 : i64, tpu.core_type = #tpu.core_type<tc>, window_params = [{transform_indices = @transform_0, window_bounds = array<i64: 1, 128>}, {transform_indices = @transform_1, window_bounds = array<i64: 128, 32>}, {pipeline_mode = #tpu.pipeline_mode<synchronous>, transform_indices = @transform_2, window_bounds = array<i64: 8, 1>}, {pipeline_mode = #tpu.pipeline_mode<synchronous>, transform_indices = @transform_3, window_bounds = array<i64: 32, 128>}, {pipeline_mode = #tpu.pipeline_mode<synchronous>, transform_indices = @transform_4, window_bounds = array<i64: 1, 128>}, {pipeline_mode = #tpu.pipeline_mode<synchronous>, transform_indices = @transform_5, window_bounds = array<i64: 8, 128>}]} {
    %c0_i32 = arith.constant 0 : i32
    %0 = arith.cmpi eq, %arg0, %c0_i32 : i32
    %1 = arith.extui %0 : i1 to i32
    %c0_i32_0 = arith.constant 0 : i32
    %2 = arith.cmpi ne, %1, %c0_i32_0 : i32
    scf.if %2 {
      %cst_10 = arith.constant 0.000000e+00 : f32
      %29 = vector.broadcast %cst_10 : f32 to vector<8x32xf32>
      %c0_11 = arith.constant 0 : index
      %c0_12 = arith.constant 0 : index
      %30 = vector.load %arg7[%c0_11, %c0_12] : memref<8x32xf32, #tpu.memory_space<vmem>>, vector<8x32xf32>
      tpu.vector_store %arg7[%c0_11, %c0_12], %29 {strides = array<i32>} : memref<8x32xf32, #tpu.memory_space<vmem>>, vector<8x32xf32>,
    } else {
    }
    %3 = tpu.iota {dimensions = array<i32: 0>} : vector<128x1xi32>
    %c128_i32 = arith.constant 128 : i32
    %4 = arith.muli %arg0, %c128_i32 : i32
    %5 = vector.broadcast %4 : i32 to vector<128x1xi32>
    %6 = arith.addi %3, %5 : vector<128x1xi32>
    %c300_i32 = arith.constant 300 : i32
    %7 = vector.broadcast %c300_i32 : i32 to vector<128x1xi32>
    %8 = arith.cmpi slt, %6, %7 : vector<128x1xi32>
    %c0 = arith.constant 0 : index
    %c0_1 = arith.constant 0 : index
    %9 = vector.load %arg2[%c0, %c0_1] : memref<128x32xf32, #tpu.memory_space<vmem>>, vector<128x32xf32>
    %cst = arith.constant 0.000000e+00 : f32
    %10 = vector.shape_cast %8 : vector<128x1xi1> to vector<128x1xi1>
    %11 = vector.broadcast %10 : vector<128x1xi1> to vector<128x32xi1>
    %12 = vector.broadcast %cst : f32 to vector<128x32xf32>
    %13 = arith.select %11, %9, %12 : vector<128x32xi1>, vector<128x32xf32>
    %14 = tpu.iota {dimensions = array<i32: 0>} : vector<8x128xi32>
    %c0_2 = arith.constant 0 : index
    %c0_3 = arith.constant 0 : index
    %15 = vector.load %arg1[%c0_2, %c0_3] : memref<1x128xi32, #tpu.memory_space<vmem>>, vector<1x128xi32>
    %16 = vector.broadcast %15 : vector<1x128xi32> to vector<8x128xi32>
    %17 = arith.cmpi eq, %16, %14 : vector<8x128xi32>
    %18 = arith.extui %17 : vector<8x128xi1> to vector<8x128xi32>
    %19 = arith.sitofp %18 : vector<8x128xi32> to vector<8x128xf32>
    %20 = arith.truncf %19 : vector<8x128xf32> to vector<8x128xbf16>
    %c0_4 = arith.constant 0 : index
    %c0_5 = arith.constant 0 : index
    %21 = vector.load %arg7[%c0_4, %c0_5] : memref<8x32xf32, #tpu.memory_space<vmem>>, vector<8x32xf32>
    %22 = arith.truncf %13 : vector<128x32xf32> to vector<128x32xbf16>
    %cst_6 = arith.constant dense<0.000000e+00> : vector<8x32xf32>
    %23 = tpu.matmul %20, %22, %cst_6 {dimension_numbers = #tpu.dot_dimension_numbers<[1], [0], [0], [1], [0, 0, 1, 1], [], []>} : vector<8x128xbf16>, vector<128x32xbf16>, vector<8x32xf32> -> vector<8x32xf32>
    %24 = arith.addf %21, %23 : vector<8x32xf32>
    %c0_7 = arith.constant 0 : index
    %c0_8 = arith.constant 0 : index
    %25 = vector.load %arg7[%c0_7, %c0_8] : memref<8x32xf32, #tpu.memory_space<vmem>>, vector<8x32xf32>
    tpu.vector_store %arg7[%c0_7, %c0_8], %24 {strides = array<i32>} : memref<8x32xf32, #tpu.memory_space<vmem>>, vector<8x32xf32>,
    %c2_i32 = arith.constant 2 : i32
    %26 = arith.cmpi eq, %arg0, %c2_i32 : i32
    %27 = arith.extui %26 : i1 to i32
    %c0_i32_9 = arith.constant 0 : i32
    %28 = arith.cmpi ne, %27, %c0_i32_9 : i32
    scf.if %28 {
      %c0_10 = arith.constant 0 : index
      %c0_11 = arith.constant 0 : index
      %29 = vector.load %arg7[%c0_10, %c0_11] : memref<8x32xf32, #tpu.memory_space<vmem>>, vector<8x32xf32>
      %c0_12 = arith.constant 0 : index
      %c0_13 = arith.constant 0 : index
      %30 = vector.load %arg3[%c0_12, %c0_13] : memref<8x1xf32, #tpu.memory_space<vmem>>, vector<8x1xf32>
      %31 = vector.broadcast %30 : vector<8x1xf32> to vector<8x32xf32>
      %32 = arith.mulf %29, %31 : vector<8x32xf32>
      %33 = arith.truncf %32 : vector<8x32xf32> to vector<8x32xbf16>
      %c0_14 = arith.constant 0 : index
      %c0_15 = arith.constant 0 : index
      %34 = vector.load %arg4[%c0_14, %c0_15] : memref<32x128xbf16, #tpu.memory_space<vmem>>, vector<32x128xbf16>
      %cst_16 = arith.constant dense<0.000000e+00> : vector<8x128xf32>
      %35 = tpu.matmul %33, %34, %cst_16 {dimension_numbers = #tpu.dot_dimension_numbers<[1], [0], [0], [1], [0, 0, 1, 1], [], []>} : vector<8x32xbf16>, vector<32x128xbf16>, vector<8x128xf32> -> vector<8x128xf32>
      %c0_17 = arith.constant 0 : index
      %c0_18 = arith.constant 0 : index
      %36 = vector.load %arg5[%c0_17, %c0_18] : memref<1x128xf32, #tpu.memory_space<vmem>>, vector<1x128xf32>
      %37 = vector.broadcast %36 : vector<1x128xf32> to vector<8x128xf32>
      %38 = arith.addf %35, %37 : vector<8x128xf32>
      %c0_19 = arith.constant 0 : index
      %c0_20 = arith.constant 0 : index
      %39 = vector.load %arg6[%c0_19, %c0_20] : memref<8x128xf32, #tpu.memory_space<vmem>>, vector<8x128xf32>
      tpu.vector_store %arg6[%c0_19, %c0_20], %38 {strides = array<i32>} : memref<8x128xf32, #tpu.memory_space<vmem>>, vector<8x128xf32>,
    } else {
    }
    return
  }
  func.func @transform_0(%arg0: i32) -> (i32, i32) {
    %c0_i32 = arith.constant 0 : i32
    %c0_i32_0 = arith.constant 0 : i32
    return %c0_i32, %arg0 : i32, i32
  }
  func.func @transform_1(%arg0: i32) -> (i32, i32) {
    %c0_i32 = arith.constant 0 : i32
    %c0_i32_0 = arith.constant 0 : i32
    return %arg0, %c0_i32 : i32, i32
  }
  func.func @transform_2(%arg0: i32) -> (i32, i32) {
    %c0_i32 = arith.constant 0 : i32
    %c0_i32_0 = arith.constant 0 : i32
    %c0_i32_1 = arith.constant 0 : i32
    return %c0_i32, %c0_i32_0 : i32, i32
  }
  func.func @transform_3(%arg0: i32) -> (i32, i32) {
    %c0_i32 = arith.constant 0 : i32
    %c0_i32_0 = arith.constant 0 : i32
    %c0_i32_1 = arith.constant 0 : i32
    return %c0_i32, %c0_i32_0 : i32, i32
  }
  func.func @transform_4(%arg0: i32) -> (i32, i32) {
    %c0_i32 = arith.constant 0 : i32
    %c0_i32_0 = arith.constant 0 : i32
    %c0_i32_1 = arith.constant 0 : i32
    return %c0_i32, %c0_i32_0 : i32, i32
  }
  func.func @transform_5(%arg0: i32) -> (i32, i32) {
    %c0_i32 = arith.constant 0 : i32
    %c0_i32_0 = arith.constant 0 : i32
    %c0_i32_1 = arith.constant 0 : i32
    return %c0_i32, %c0_i32_0 : i32, i32
  }
}

</mosaic_0001>

<bundles_post_ra>
// kernel: tpu_custom_call.1
= control target key start
LH: loop header
LB: loop body
LE: loop exit
PB: predicated region body
PF: predicated region fallthrough
CT: control target
= control target key end

     0   :  { %10 = vsyncpa [#allocation4], 0  ;;  %s653_s18 = smov 0   ;;  %s759_s0 = inlined_call_operand.vmem [shape: s32[1,300], index: 0, kind: input, shape index: {}]   ;;  %s760_s1 = inlined_call_operand.vmem [shape: f32[300,32], index: 1, kind: input, shape index: {}]   ;;  %s761_s2 = inlined_call_operand.vmem [shape: f32[8,1], index: 2, kind: input, shape index: {}]   ;;  %s762_s3 = inlined_call_operand.vmem [shape: bf16[32,128], index: 3, kind: input, shape index: {}]   ;;  %s763_s4 = inlined_call_operand.vmem [shape: f32[1,128], index: 4, kind: input, shape index: {}]   ;;  %s764_s5 = inlined_call_operand.hbm [shape: f32[8,128], index: 5, kind: output, shape index: {}]  }
   0x1 LB: > { %s659_s19 = sadd.s32 4294967295, %s617_s18   ;;  %p510_p0 = scmp.ge.s32.totalorder %s617_s18, 1  ;;  %s617_s18 = sphi %s653_s18, %s16_s18  }
   0x2   : > { %p200_p1 = scmp.lt.s32.totalorder %s617_s18, 4 }
   0x4   : > { %p201_p2 = pnand %p510_p0, %p200_p1 }
   0x5   : > { %p230_p3 = scmp.lt.s32.totalorder (!%p201_p2), %s659_s19, 2  ;;  %s511_s20 = sshll.u32 (!%p201_p2), %s659_s19, 4 }
   0x6   : > { %204 = sbr.rel (%p201_p2) target bundleno = 454 (0x1c6), region = 40  ;;  %p238_p4 = scmp.lt.s32.totalorder (!%p201_p2), %s511_s20, 37 }
   0x7   : > { %p513_p5 = scmp.ne.s32.totalorder (!%p201_p2), %s659_s19, 0 }
   0xb   : > { %s666_s21 = scalar_select %p230_p3, %s659_s19, 2 }
   0xc   : > { %s766_s20 = smov (!%p238_p4, %s511_s20), 37  ;;  %251 = sbr.rel (%p513_p5) target bundleno = 19 (0x13), region = 44 }
   0xd   : > { %s232_s24 = scalar_lea.vmem %s759_s0, %s666_s21  ;;  %s512_s25 = sshll.u32 %s766_s20, 3 }
   0xe   : > { %s675_s28 = scalar_lea.vmem %s760_s1, %s512_s25 }
  0x11   : > { %vm252_vm0 = vcmask 261120   ;;  %v619_v0 = vmov 0.0  }
  0x12   : > { %253 = vst.msk [vmem:[#allocation2] sm:$0xff] %vm252_vm0, %v619_v0 }
  0x13 PF: > { %v254_v1 = vlaneseq  ;;  %s514_s29 = sshll.u32 %s659_s19, 7  ;;  %v319_v3 = vld [vmem:[%s675_s28 + $0x70] sm:$0xff]  ;;  %v320_v4 = vld [vmem:[%s675_s28 + $0x78] sm:$0xff]  ;;  %v317_v17 = vld [vmem:[%s675_s28 + $0x60] sm:$0xff]  ;;  %v620_v60 = vmov 1.0|1.0  }
  0x14   : > { %v683_v5 = vstv %s514_s29  ;;  %v517_v10 = vpack.c.bf16 %v320_v4, %v319_v3  ;;  %v318_v18 = vld [vmem:[%s675_s28 + $0x68] sm:$0xff]  ;;  %v315_v24 = vld [vmem:[%s675_s28 + $0x50] sm:$0xff]  ;;  %v316_v25 = vld [vmem:[%s675_s28 + $0x58] sm:$0xff]  ;;  %p542_p6 = scmp.ne.s32.totalorder %s659_s19, 2 }
  0x15   : > { %v679_v2 = vshrl.u32 %v254_v1, 7  ;;  %v520_v23 = vpack.c.bf16 %v318_v18, %v317_v17  ;;  %v523_v30 = vpack.c.bf16 %v316_v25, %v315_v24  ;;  %v313_v31 = vld [vmem:[%s675_s28 + $0x40] sm:$0xff]  ;;  %v314_v32 = vld [vmem:[%s675_s28 + $0x48] sm:$0xff]  ;;  %v311_v38 = vld [vmem:[%s675_s28 + $0x30] sm:$0xff] }
  0x16   : > { %v526_v37 = vpack.c.bf16 %v314_v32, %v313_v31  ;;  %v312_v39 = vld [vmem:[%s675_s28 + $0x38] sm:$0xff]  ;;  %v309_v45 = vld [vmem:[%s675_s28 + $0x20] sm:$0xff]  ;;  %v310_v46 = vld [vmem:[%s675_s28 + $0x28] sm:$0xff] }
  0x17   : > { %v269_v6 = vadd.s32 112, %v679_v2  ;;  %v270_v7 = vadd.s32 120, %v679_v2  ;;  %v267_v8 = vadd.s32 96, %v679_v2  ;;  %v268_v9 = vadd.s32 104, %v679_v2  ;;  %v307_v51 = vld [vmem:[%s675_s28 + $0x10] sm:$0xff]  ;;  %v308_v52 = vld [vmem:[%s675_s28 + $0x18] sm:$0xff] }
  0x18   : > { %v265_v11 = vadd.s32 80, %v679_v2  ;;  %v266_v12 = vadd.s32 88, %v679_v2  ;;  %v263_v21 = vadd.s32 64, %v679_v2  ;;  %v264_v22 = vadd.s32 72, %v679_v2  ;;  %v305_v56 = vld [vmem:[%s675_s28] sm:$0xff]  ;;  %v306_v57 = vld [vmem:[%s675_s28 + $0x8] sm:$0xff] }
  0x19   : > { %v287_v13 = vadd.s32 %v683_v5, %v269_v6  ;;  %v288_v14 = vadd.s32 %v683_v5, %v270_v7  ;;  %v285_v15 = vadd.s32 %v683_v5, %v267_v8  ;;  %v286_v16 = vadd.s32 %v683_v5, %v268_v9  ;;  %v576_v58 = vld [vmem:[%s232_s24] ss:$0 sm:$0xff] }
  0x1a   : > { %v283_v19 = vadd.s32 %v683_v5, %v265_v11  ;;  %v284_v20 = vadd.s32 %v683_v5, %v266_v12  ;;  %v281_v26 = vadd.s32 %v683_v5, %v263_v21  ;;  %v282_v27 = vadd.s32 %v683_v5, %v264_v22  ;;  %v375_v61 = vld [vmem:[#allocation2] sm:$0xff] }
  0x1b   : > { %vm303_vm1 = vcmp.lt.s32.totalorder %v287_v13, 300  ;;  %vm304_vm2 = vcmp.lt.s32.totalorder %v288_v14, 300  ;;  %vm301_vm3 = vcmp.lt.s32.totalorder %v285_v15, 300  ;;  %vm302_vm4 = vcmp.lt.s32.totalorder %v286_v16, 300 }
  0x1c   : > { %vm516_vm5 = vmpackc.low %vm304_vm2, %vm303_vm1  ;;  %vm299_vm7 = vcmp.lt.s32.totalorder %v283_v19, 300  ;;  %vm300_vm8 = vcmp.lt.s32.totalorder %v284_v20, 300  ;;  %v261_v28 = vadd.s32 48, %v679_v2  ;;  %v262_v29 = vadd.s32 56, %v679_v2 }
  0x1d   : > { %518 = vmatpush.bf16.msk.msra.mxu0 %vm516_vm5, %v517_v10  ;;  %vm519_vm6 = vmpackc.low %vm302_vm4, %vm301_vm3  ;;  %vm297_vm10 = vcmp.lt.s32.totalorder %v281_v26, 300  ;;  %vm298_vm11 = vcmp.lt.s32.totalorder %v282_v27, 300  ;;  %v259_v35 = vadd.s32 32, %v679_v2  ;;  %v260_v36 = vadd.s32 40, %v679_v2 }
  0x1e   : > { %vm522_vm9 = vmpackc.low %vm300_vm8, %vm299_vm7  ;;  %v279_v33 = vadd.s32 %v683_v5, %v261_v28  ;;  %v280_v34 = vadd.s32 %v683_v5, %v262_v29  ;;  %v257_v40 = vadd.s32 16, %v679_v2  ;;  %v258_v41 = vadd.s32 24, %v679_v2 }
  0x1f   : > { %vm525_vm12 = vmpackc.low %vm298_vm11, %vm297_vm10  ;;  %v277_v42 = vadd.s32 %v683_v5, %v259_v35  ;;  %v278_v43 = vadd.s32 %v683_v5, %v260_v36  ;;  %v529_v44 = vpack.c.bf16 %v312_v39, %v311_v38  ;;  %v256_v49 = vadd.s32 8, %v679_v2 }
  0x20   : > { %vm295_vm13 = vcmp.lt.s32.totalorder %v279_v33, 300  ;;  %vm296_vm14 = vcmp.lt.s32.totalorder %v280_v34, 300  ;;  %v275_v47 = vadd.s32 %v683_v5, %v257_v40  ;;  %v276_v48 = vadd.s32 %v683_v5, %v258_v41 }
  0x21   : > { %521 = vmatpush.bf16.msk.msra.mxu0 %vm519_vm6, %v520_v23  ;;  %vm528_vm15 = vmpackc.low %vm296_vm14, %vm295_vm13  ;;  %vm293_vm0 = vcmp.lt.s32.totalorder %v277_v42, 300  ;;  %vm294_vm1 = vcmp.lt.s32.totalorder %v278_v43, 300  ;;  %v532_v50 = vpack.c.bf16 %v310_v46, %v309_v45  ;;  %v273_v53 = vadd.s32 %v683_v5, %v679_v2 }
  0x22   : > { %vm531_vm2 = vmpackc.low %vm294_vm1, %vm293_vm0  ;;  %vm291_vm3 = vcmp.lt.s32.totalorder %v275_v47, 300  ;;  %vm292_vm4 = vcmp.lt.s32.totalorder %v276_v48, 300  ;;  %v274_v54 = vadd.s32 %v683_v5, %v256_v49  ;;  %v535_v55 = vpack.c.bf16 %v308_v52, %v307_v51 }
  0x23   : > { %vm534_vm5 = vmpackc.low %vm292_vm4, %vm291_vm3  ;;  %vm289_vm6 = vcmp.lt.s32.totalorder %v273_v53, 300  ;;  %v538_v59 = vpack.c.bf16 %v306_v57, %v305_v56  ;;  %vm398_vm11 = vcmask 261120  }
  0x24   : > { %vm290_vm7 = vcmp.lt.s32.totalorder %v274_v54, 300 }
  0x25   : > { %524 = vmatpush.bf16.msk.msra.mxu0 %vm522_vm9, %v523_v30  ;;  %vm537_vm8 = vmpackc.low %vm290_vm7, %vm289_vm6  ;;  %vm371_vm9 = vcmp.eq.s32.totalorder %v576_v58, %v679_v2 }
  0x26   : > { %vm540_vm10 = vmpackc.low %vm371_vm9, %vm371_vm9 }
  0x29   : > { %527 = vmatpush.bf16.msk.msra.mxu0 %vm525_vm12, %v526_v37 }
  0x2d   : > { %530 = vmatpush.bf16.msk.msra.mxu0 %vm528_vm15, %v529_v44 }
  0x31   : > { %533 = vmatpush.bf16.msk.msra.mxu0 %vm531_vm2, %v532_v50 }
  0x35   : > { %536 = vmatpush.bf16.msk.msra.mxu0 %vm534_vm5, %v535_v55 }
  0x39   : > { %539 = vmatpush.bf16.msk.msra.mxu0 %vm537_vm8, %v538_v59 }
  0x3c   : > { %541 = vmatmul.msk.bf16.vlgmr.msra.gmra.mxu0 %vm540_vm10, %v620_v60 }
  0xb9   : > { %v393_v62 = vpop.f32.mrf.mxu0 }
  0xba   : > { %v397_v63 = vadd.f32 %v393_v62, %v375_v61 }
  0xbc   : > { %399 = vst.msk [vmem:[#allocation2] sm:$0xff] %vm398_vm11, %v397_v63 }
  0xbd   : > { %403 = sbr.rel (%p542_p6) target bundleno = 449 (0x1c1), region = 48 }
  0xc1   : > { %v395_v0 = vpop.f32.mrf.mxu0 }
  0xc2   : > { %v405_v1 = vld [vmem:[%s761_s2] sm:$0xff]  ;;  %v557_v2 = vld [vmem:[%s762_s3 + $0x8] sm:$0xff]  ;;  %v621_v3 = vmov 0  }
  0xc3   : > { %577 = vset.pattern.permute.xlu0 %v621_v3  ;;  %442 = vmatpush.bf16.msra.mxu0 %v557_v2  ;;  %v556_v4 = vld [vmem:[%s762_s3] sm:$0xff] }
  0xc4   : > { %408 = vperm.xlu0 %577, %v405_v1   ;;  %v404_v5 = vld [vmem:[#allocation2] sm:$0xff] }
  0xc5   : > { %v578_v9 = vld [vmem:[%s763_s4] ss:$0 sm:$0xff] }
  0xc7   : > { %443 = vmatpush.bf16.msra.mxu0 %v556_v4 }
 0x136   : > { %v409_v6 = vpop.permute.xlu0 %408 }
 0x137   : > { %v411_v7 = vmul.f32 %v409_v6, %v404_v5 }
 0x139   : > { %v412_v8 = vpack.c.bf16 %v411_v7, %v411_v7 }
 0x13b   : > { %551 = vmatmul.msk.bf16.vlgmr.msra.gmra.mxu0 %vm398_vm11, %v412_v8 }
 0x1b8   : > { %v445_v10 = vpop.f32.mrf.mxu0 }
 0x1b9   : > { %v446_v11 = vadd.f32 %v578_v9, %v445_v10 }
 0x1bb   : > { %449 = vst [vmem:[#allocation3] sm:$0xff] %v446_v11 }
 0x1c0   : > { %v447_v12 = vpop.f32.mrf.mxu0 }
 0x1c1 PF: > { %p562_p7 = scmp.eq.s32.totalorder %s659_s19, 2  ;;  %s622_s15 = smov [#allocation3]  }
 0x1c2   : > { %s456_s16 = sshll.u32 %s622_s15, 4  ;;  %s458_s21 = sshll.u32 %s764_s5, 4  ;;  %s457_s16 = int_to_ptr.vmem [resolvable:$true] %s456_s16  ;;  %s459_s21 = int_to_ptr.hbm [resolvable:$true] %s458_s21 }
 0x1c3   : > { %559 = dma.vmem_to_hbm [thread:$0]  (%p562_p7), %s457_s16, 128, %s459_s21, [#allocation4]  }
 0x1c4   : > { %612 = dma.done.wait (%p562_p7), [#allocation4], 128  }
 0x1c5   : > { %614 = vsyncadd (%p562_p7), [#allocation4], 4294967168 }
 0x1c6 PF: > { %s16_s18 = sadd.s32 1, %s617_s18  }
 0x1c7   : > { %p13_p8 = scmp.ge.s32.totalorder %s16_s18, 5  }
 0x1c9   :  { %15 = sbr.rel (!%p13_p8) target bundleno = 1 (0x1), region = 78 }
 0x1ce   :  { %472 = vsyncpa [#allocation4], 1 }
 0x1cf   :  { %474 = vsyncpa [#allocation4 + $0x1], 1 }

</bundles_post_ra>
